<compile_context>
chip_gen: v6e
topology: v6e:2x2x1
jax: 0.10.0
libtpu: 0.0.40
codegen_flags: <defaults>
</compile_context>

<pallas_src>
import functools

import jax
import jax.numpy as jnp
from jax.experimental import pallas as pl
from jax.experimental.pallas import tpu as pltpu


# ----------------------------- Pallas kernel -------------------------------


def moe_expert_kernel(block_expert_ref, block_valid_ref,   # scalar-prefetch (SMEM)
                      x_ref, w1_ref, w3_ref, w2_ref, cw_ref,
                      o_ref, acc_ref):
    del block_expert_ref          # consumed only by the index_maps
    i = pl.program_id(0)          # token-block index (sorted / padded layout)
    f = pl.program_id(1)          # FFN (F) tile index
    nf = pl.num_programs(1)
    valid = block_valid_ref[i] != 0

    @pl.when(valid)
    def _():
        @pl.when(f == 0)
        def _():
            acc_ref[...] = jnp.zeros_like(acc_ref)

        x = x_ref[...]                                                     # (TM, D)
        h1 = jnp.dot(x, w1_ref[...], preferred_element_type=jnp.float32)  # (TM, TF)
        h3 = jnp.dot(x, w3_ref[...], preferred_element_type=jnp.float32)  # (TM, TF)
        h = (h1 * jax.nn.sigmoid(h1)) * h3                                 # SiLU gate, fp32
        acc_ref[...] += jnp.dot(h.astype(x.dtype), w2_ref[...],
                                preferred_element_type=jnp.float32)        # (TM, D)

        @pl.when(f == nf - 1)
        def _():
            # cw is fp32 (TM, 1); acc is fp32 (TM, D).
            o_ref[...] = (cw_ref[...] * acc_ref[...]).astype(o_ref.dtype)

    @pl.when(jnp.logical_and(jnp.logical_not(valid), f == nf - 1))
    def _():
        # Pure-padding block: compute skipped, weight DMAs elided by the pinned
        # index_maps; write zeros so the scatter-add's dummy row stays finite.
        o_ref[...] = jnp.zeros_like(o_ref)


# --------------------------- tiling heuristics ------------------------------


def _round_up(v, m):
    return ((v + m - 1) // m) * m


def _vmem_limit_bytes():
    cap = 64 * 1024 * 1024            # conservative fallback (v7x-sized VMEM)
    try:
        cap = int(pltpu.get_tpu_info().vmem_capacity_bytes)
    except Exception:
        pass
    return (cap * 3) // 4             # ~96 MiB on 128-MiB parts, ~48 MiB on v7x


def _pick_tiles(TK, E, D, F, compute_bytes, out_bytes, vmem_budget):
    # Token-block: aim at the MXU ridge (hundreds of rows so the 3*D*F weight
    # bytes are amortised), capped by the average tokens-per-expert so tiny
    # workloads do not become pure padding.
    avg_per_expert = max((TK + E - 1) // max(E, 1), 1)
    tm = min(512, max(128, _round_up(avg_per_expert, 128)))

    # F tile: whole expert when its weights fit double-buffered, else 512/256/128.
    if 2 * 3 * D * F * compute_bytes <= vmem_budget // 3:
        tf = F
    else:
        tf = next((c for c in (512, 256, 128) if F % c == 0), F)

    def _est(tm_, tf_):
        return (2 * tm_ * D * compute_bytes        # x tile (double-buffered)
                + 2 * tm_ * D * out_bytes          # out tile
                + tm_ * D * 4                      # fp32 accumulator scratch
                + 2 * 3 * D * tf_ * compute_bytes  # w1/w3/w2 tiles
                + 3 * tm_ * tf_ * 4                # h1/h3/h fp32 temporaries
                + 2 * tm_ * 4)                     # combine weights

    def _shrink_tf(t):
        for c in (512, 256, 128):
            if c < t and F % c == 0:
                return c
        return t

    while _est(tm, tf) > (vmem_budget * 4) // 5:
        nt = _shrink_tf(tf)
        if nt < tf:
            tf = nt
        elif tm > 128:
            tm //= 2
        else:
            break
    return tm, tf


# ------------------------------- Wrapper -----------------------------------


def moe_forward(x_raw, params, num_experts_per_tok, *, tm=None, tf=None,
                compute_dtype=None):
    ishape = x_raw.shape
    D = ishape[-1]
    x = x_raw.reshape(-1, D)
    T = x.shape[0]
    K = num_experts_per_tok

    wg = params["wg"]                 # (D, E)
    w1 = params["w1"]                 # (E, D, F)
    w3 = params["w3"]                 # (E, D, F)
    w2 = params["w2"]                 # (E, F, D)
    E = wg.shape[1]
    F = w1.shape[2]

    out_dtype = x.dtype
    cdt = jnp.dtype(compute_dtype) if compute_dtype is not None else x.dtype
    vmem_limit = _vmem_limit_bytes()

    TK = T * K
    auto_tm, auto_tf = _pick_tiles(TK, E, D, F, jnp.dtype(cdt).itemsize,
                                   jnp.dtype(out_dtype).itemsize, vmem_limit)
    TM = tm if tm is not None else auto_tm            # 8|f32, 16|bf16 multiples
    TF = tf if tf is not None else auto_tf            # multiple of 128 or == F
    assert F % TF == 0, "F must be divisible by TF"
    num_f = F // TF
    last_f = num_f - 1

    # ---- routing (plain JAX; gate logits stay fp32 through top_k/softmax) ----
    gate_logits = jnp.dot(x.astype(jnp.float32), wg.astype(jnp.float32))   # (T, E)
    topk_w, topk_idx = jax.lax.top_k(gate_logits, K)
    topk_w = jax.nn.softmax(topk_w, axis=-1)                               # fp32

    flat_expert = topk_idx.reshape(TK).astype(jnp.int32)
    flat_token = jnp.arange(TK, dtype=jnp.int32) // K
    flat_w = topk_w.reshape(TK)

    order = jnp.argsort(flat_expert)                  # sort token-slots by expert
    sorted_expert = flat_expert[order]
    sorted_token = flat_token[order]
    sorted_w = flat_w[order]

    # Group sizes + per-expert layout padded to a multiple of TM.
    group_sizes = jnp.bincount(flat_expert, length=E).astype(jnp.int32)
    padded_sizes = ((group_sizes + TM - 1) // TM) * TM
    padded_ends = jnp.cumsum(padded_sizes)
    padded_starts = padded_ends - padded_sizes
    excl = jnp.cumsum(group_sizes) - group_sizes

    num_blocks = pl.cdiv(TK, TM) + E                  # static upper bound
    cap = num_blocks * TM

    rank = jnp.arange(TK, dtype=jnp.int32) - excl[sorted_expert]
    dest = padded_starts[sorted_expert] + rank        # slot in padded layout

    gather_idx = jnp.zeros((cap,), jnp.int32).at[dest].set(sorted_token)
    scatter_idx = jnp.full((cap,), T, jnp.int32).at[dest].set(sorted_token)   # T = dummy row
    cw = jnp.zeros((cap, 1), jnp.float32).at[dest, 0].set(sorted_w)           # fp32 combine

    # Per-block metadata, scalar-prefetched into SMEM for data-dependent index_maps.
    row0 = jnp.arange(num_blocks, dtype=jnp.int32) * TM
    raw = jnp.searchsorted(padded_ends, row0, side="right").astype(jnp.int32)
    block_valid = (raw < E).astype(jnp.int32)
    expert_clamped = jnp.minimum(raw, E - 1)
    # Pure-padding blocks live at the tail; pin their expert id to the last
    # valid block's expert so the weight index_maps repeat the previous block
    # index and Pallas elides the (otherwise wasted) weight DMAs.
    num_valid_blocks = padded_ends[-1] // TM
    last_valid_expert = expert_clamped[jnp.maximum(num_valid_blocks - 1, 0)]
    block_expert = jnp.where(block_valid == 1, expert_clamped,
                             last_valid_expert).astype(jnp.int32)

    # TODO(synk): gather + final scatter-add stay in XLA (see header note).
    x_sorted = x[gather_idx].astype(cdt)              # (cap, D) gathered tokens
    w1c = w1.astype(cdt)
    w3c = w3.astype(cdt)
    w2c = w2.astype(cdt)

    def _wf(f, bv_i):
        # f index for weight tiles; pinned to the last f step on padding blocks
        # so the weight block index never changes there (DMA elided).
        return f * bv_i + last_f * (1 - bv_i)

    y_sorted = pl.pallas_call(
        moe_expert_kernel,
        out_shape=jax.ShapeDtypeStruct((cap, D), out_dtype),
        grid_spec=pltpu.PrefetchScalarGridSpec(
            num_scalar_prefetch=2,
            grid=(num_blocks, num_f),
            in_specs=[
                pl.BlockSpec((TM, D), lambda i, f, be, bv: (i, 0)),
                pl.BlockSpec((None, D, TF),
                             lambda i, f, be, bv: (be[i], 0, _wf(f, bv[i]))),
                pl.BlockSpec((None, D, TF),
                             lambda i, f, be, bv: (be[i], 0, _wf(f, bv[i]))),
                pl.BlockSpec((None, TF, D),
                             lambda i, f, be, bv: (be[i], _wf(f, bv[i]), 0)),
                pl.BlockSpec((TM, 1), lambda i, f, be, bv: (i, 0)),
            ],
            out_specs=pl.BlockSpec((TM, D), lambda i, f, be, bv: (i, 0)),
            scratch_shapes=[pltpu.VMEM((TM, D), jnp.float32)],
        ),
        compiler_params=pltpu.CompilerParams(
            dimension_semantics=("parallel", "arbitrary"),
            vmem_limit_bytes=vmem_limit,
        ),
    )(block_expert, block_valid, x_sorted, w1c, w3c, w2c, cw)

    # Scatter-add the K weighted expert outputs back to token order.
    out = jnp.zeros((T + 1, D), out_dtype).at[scatter_idx].add(y_sorted)[:T]
    return out.reshape(ishape)


# --------------------------- Pure-JAX reference -----------------------------


def moe_ref(x_raw, params, k):
    ishape = x_raw.shape
    x = x_raw.reshape(-1, ishape[-1])
    logits = jnp.dot(x.astype(jnp.float32), params["wg"].astype(jnp.float32))
    w, sel = jax.lax.top_k(logits, k)
    w = jax.nn.softmax(w, axis=-1).astype(x.dtype)
    out = jnp.zeros_like(x)
    for i in range(params["w1"].shape[0]):
        h = jax.nn.silu(x @ params["w1"][i]) * (x @ params["w3"][i])
        y = h @ params["w2"][i]
        wi = jnp.sum(w * (sel == i).astype(x.dtype), axis=1, keepdims=True)
        out = out + wi * y
    return out.reshape(ishape)


# ---------------------------------- main ------------------------------------


if __name__ == "__main__":
    B, S, D = 2, 8, 32          # inputs_raw: (batch, seq, hidden)
    E, F, K = 4, 512, 2         # num_experts, ffn hidden, experts per token

    key = jax.random.PRNGKey(0)
    k_x, k_g, k_1, k_3, k_2 = jax.random.split(key, 5)

    x_raw = jax.random.normal(k_x, (B, S, D), dtype=jnp.float32)
    params = {
        "wg": 0.05 * jax.random.normal(k_g, (D, E), dtype=jnp.float32),
        "w1": 0.05 * jax.random.normal(k_1, (E, D, F), dtype=jnp.float32),
        "w3": 0.05 * jax.random.normal(k_3, (E, D, F), dtype=jnp.float32),
        "w2": 0.05 * jax.random.normal(k_2, (E, F, D), dtype=jnp.float32),
    }

    ref = moe_ref(x_raw, params, K)

    # 1) fp32 path with small explicit tiles: exercises multiple token blocks,
    #    the F-tile accumulator loop, the data-dependent expert index_map and
    #    the padding-block skip / weight-DMA-elision path.
    fwd32 = jax.jit(functools.partial(moe_forward, num_experts_per_tok=K,
                                      tm=8, tf=256))
    out32 = jax.block_until_ready(fwd32(x_raw, params))
    assert out32.shape == x_raw.shape and out32.dtype == x_raw.dtype
    assert jnp.allclose(out32, ref, atol=1e-4, rtol=1e-4), "fp32 mismatch vs reference"

    # 2) bf16 compute path with generation-derived default tiles (TF == F here,
    #    single f step; fp32 accumulation and fp32 combine weights retained).
    fwd16 = jax.jit(functools.partial(moe_forward, num_experts_per_tok=K,
                                      compute_dtype=jnp.bfloat16))
    out16 = jax.block_until_ready(fwd16(x_raw, params))
    assert out16.shape == x_raw.shape and out16.dtype == x_raw.dtype
    assert jnp.allclose(out16, ref, atol=3e-2, rtol=3e-2), "bf16 mismatch vs reference"

    print("KERNEL_OK")
</pallas_src>

<mosaic_0001>
module attributes {stable_mosaic.version = 11 : i64} {
  func.func private @main(%arg0: i32) attributes {dimension_semantics = [#tpu.dimension_semantics<core_parallel>], iteration_bounds = array<i64: 2>, tpu.core_type = #tpu.core_type<sc_scalar_subcore>, window_params = []} {
    return
  }
}

module attributes {stable_mosaic.version = 11 : i64} {
  func.func private @main(%arg0: i32) attributes {dimension_semantics = [#tpu.dimension_semantics<core_parallel>], iteration_bounds = array<i64: 2>, tpu.core_type = #tpu.core_type<sc_scalar_subcore>, window_params = []} {
    return
  }
}

module attributes {stable_mosaic.version = 11 : i64} {
  func.func @moe_expert_kernel(%arg0: i32, %arg1: i32, %arg2: memref<8xi32, #tpu.memory_space<smem>>, %arg3: memref<8xi32, #tpu.memory_space<smem>>, %arg4: memref<8x32xf32, #tpu.memory_space<vmem>>, %arg5: memref<1x32x256xf32, #tpu.memory_space<vmem>>, %arg6: memref<1x32x256xf32, #tpu.memory_space<vmem>>, %arg7: memref<1x256x32xf32, #tpu.memory_space<vmem>>, %arg8: memref<8x1xf32, #tpu.memory_space<vmem>>, %arg9: memref<8x32xf32, #tpu.memory_space<vmem>>, %arg10: memref<8x32xf32, #tpu.memory_space<vmem>>) attributes {dimension_semantics = [#tpu.dimension_semantics<parallel>, #tpu.dimension_semantics<arbitrary>], iteration_bounds = array<i64: 8, 2>, scalar_prefetch = 2 : i64, scratch_operands = 1 : i64, tpu.core_type = #tpu.core_type<tc>, window_params = [{transform_indices = @transform_0, window_bounds = array<i64: 8, 32>}, {transform_indices = @transform_1, window_bounds = array<i64: 1, 32, 256>}, {transform_indices = @transform_2, window_bounds = array<i64: 1, 32, 256>}, {transform_indices = @transform_3, window_bounds = array<i64: 1, 256, 32>}, {transform_indices = @transform_4, window_bounds = array<i64: 8, 1>}, {transform_indices = @transform_5, window_bounds = array<i64: 8, 32>}]} {
    %0 = arith.index_cast %arg0 : i32 to index
    %1 = memref.load %arg3[%0] : memref<8xi32, #tpu.memory_space<smem>>
    %c0_i32 = arith.constant 0 : i32
    %2 = arith.cmpi ne, %1, %c0_i32 : i32
    %3 = arith.extui %2 : i1 to i32
    %c0_i32_0 = arith.constant 0 : i32
    %4 = arith.cmpi ne, %3, %c0_i32_0 : i32
    scf.if %4 {
      %c0_i32_2 = arith.constant 0 : i32
      %10 = arith.cmpi eq, %arg1, %c0_i32_2 : i32
      %11 = arith.extui %10 : i1 to i32
      %c0_i32_3 = arith.constant 0 : i32
      %12 = arith.cmpi ne, %11, %c0_i32_3 : i32
      scf.if %12 {
        %cst_23 = arith.constant 0.000000e+00 : f32
        %36 = vector.broadcast %cst_23 : f32 to vector<8x32xf32>
        %c0_24 = arith.constant 0 : index
        %c0_25 = arith.constant 0 : index
        %37 = vector.load %arg10[%c0_24, %c0_25] : memref<8x32xf32, #tpu.memory_space<vmem>>, vector<8x32xf32>
        tpu.vector_store %arg10[%c0_24, %c0_25], %36 {strides = array<i32>} : memref<8x32xf32, #tpu.memory_space<vmem>>, vector<8x32xf32>,
      } else {
      }
      %c0 = arith.constant 0 : index
      %c0_4 = arith.constant 0 : index
      %13 = vector.load %arg4[%c0, %c0_4] : memref<8x32xf32, #tpu.memory_space<vmem>>, vector<8x32xf32>
      %c0_5 = arith.constant 0 : index
      %c0_6 = arith.constant 0 : index
      %c0_7 = arith.constant 0 : index
      %14 = vector.load %arg5[%c0_5, %c0_6, %c0_7] : memref<1x32x256xf32, #tpu.memory_space<vmem>>, vector<1x32x256xf32>
      %15 = vector.shape_cast %14 : vector<1x32x256xf32> to vector<32x256xf32>
      %cst = arith.constant dense<0.000000e+00> : vector<8x256xf32>
      %16 = tpu.matmul %13, %15, %cst {dimension_numbers = #tpu.dot_dimension_numbers<[1], [0], [0], [1], [0, 0, 1, 1], [], []>} : vector<8x32xf32>, vector<32x256xf32>, vector<8x256xf32> -> vector<8x256xf32>
      %c0_8 = arith.constant 0 : index
      %c0_9 = arith.constant 0 : index
      %c0_10 = arith.constant 0 : index
      %17 = vector.load %arg6[%c0_8, %c0_9, %c0_10] : memref<1x32x256xf32, #tpu.memory_space<vmem>>, vector<1x32x256xf32>
      %18 = vector.shape_cast %17 : vector<1x32x256xf32> to vector<32x256xf32>
      %cst_11 = arith.constant dense<0.000000e+00> : vector<8x256xf32>
      %19 = tpu.matmul %13, %18, %cst_11 {dimension_numbers = #tpu.dot_dimension_numbers<[1], [0], [0], [1], [0, 0, 1, 1], [], []>} : vector<8x32xf32>, vector<32x256xf32>, vector<8x256xf32> -> vector<8x256xf32>
      %20 = arith.negf %16 : vector<8x256xf32>
      %21 = math.exp %20 : vector<8x256xf32>
      %cst_12 = arith.constant 1.000000e+00 : f32
      %22 = vector.broadcast %cst_12 : f32 to vector<8x256xf32>
      %23 = arith.addf %22, %21 : vector<8x256xf32>
      %24 = arith.divf %22, %23 : vector<8x256xf32>
      %25 = arith.mulf %16, %24 : vector<8x256xf32>
      %26 = arith.mulf %25, %19 : vector<8x256xf32>
      %c0_13 = arith.constant 0 : index
      %c0_14 = arith.constant 0 : index
      %27 = vector.load %arg10[%c0_13, %c0_14] : memref<8x32xf32, #tpu.memory_space<vmem>>, vector<8x32xf32>
      %c0_15 = arith.constant 0 : index
      %c0_16 = arith.constant 0 : index
      %c0_17 = arith.constant 0 : index
      %28 = vector.load %arg7[%c0_15, %c0_16, %c0_17] : memref<1x256x32xf32, #tpu.memory_space<vmem>>, vector<1x256x32xf32>
      %29 = vector.shape_cast %28 : vector<1x256x32xf32> to vector<256x32xf32>
      %cst_18 = arith.constant dense<0.000000e+00> : vector<8x32xf32>
      %30 = tpu.matmul %26, %29, %cst_18 {dimension_numbers = #tpu.dot_dimension_numbers<[1], [0], [0], [1], [0, 0, 1, 1], [], []>} : vector<8x256xf32>, vector<256x32xf32>, vector<8x32xf32> -> vector<8x32xf32>
      %31 = arith.addf %27, %30 : vector<8x32xf32>
      %c0_19 = arith.constant 0 : index
      %c0_20 = arith.constant 0 : index
      %32 = vector.load %arg10[%c0_19, %c0_20] : memref<8x32xf32, #tpu.memory_space<vmem>>, vector<8x32xf32>
      tpu.vector_store %arg10[%c0_19, %c0_20], %31 {strides = array<i32>} : memref<8x32xf32, #tpu.memory_space<vmem>>, vector<8x32xf32>,
      %c1_i32_21 = arith.constant 1 : i32
      %33 = arith.cmpi eq, %arg1, %c1_i32_21 : i32
      %34 = arith.extui %33 : i1 to i32
      %c0_i32_22 = arith.constant 0 : i32
      %35 = arith.cmpi ne, %34, %c0_i32_22 : i32
      scf.if %35 {
        %c0_23 = arith.constant 0 : index
        %c0_24 = arith.constant 0 : index
        %36 = vector.load %arg8[%c0_23, %c0_24] : memref<8x1xf32, #tpu.memory_space<vmem>>, vector<8x1xf32>
        %c0_25 = arith.constant 0 : index
        %c0_26 = arith.constant 0 : index
        %37 = vector.load %arg10[%c0_25, %c0_26] : memref<8x32xf32, #tpu.memory_space<vmem>>, vector<8x32xf32>
        %38 = vector.broadcast %36 : vector<8x1xf32> to vector<8x32xf32>
        %39 = arith.mulf %38, %37 : vector<8x32xf32>
        %c0_27 = arith.constant 0 : index
        %c0_28 = arith.constant 0 : index
        %40 = vector.load %arg9[%c0_27, %c0_28] : memref<8x32xf32, #tpu.memory_space<vmem>>, vector<8x32xf32>
        tpu.vector_store %arg9[%c0_27, %c0_28], %39 {strides = array<i32>} : memref<8x32xf32, #tpu.memory_space<vmem>>, vector<8x32xf32>,
      } else {
      }
    } else {
    }
    %true = arith.constant true
    %5 = arith.xori %2, %true : i1
    %c1_i32 = arith.constant 1 : i32
    %6 = arith.cmpi eq, %arg1, %c1_i32 : i32
    %7 = arith.andi %5, %6 : i1
    %8 = arith.extui %7 : i1 to i32
    %c0_i32_1 = arith.constant 0 : i32
    %9 = arith.cmpi ne, %8, %c0_i32_1 : i32
    scf.if %9 {
      %cst = arith.constant 0.000000e+00 : f32
      %10 = vector.broadcast %cst : f32 to vector<8x32xf32>
      %c0 = arith.constant 0 : index
      %c0_2 = arith.constant 0 : index
      %11 = vector.load %arg9[%c0, %c0_2] : memref<8x32xf32, #tpu.memory_space<vmem>>, vector<8x32xf32>
      tpu.vector_store %arg9[%c0, %c0_2], %10 {strides = array<i32>} : memref<8x32xf32, #tpu.memory_space<vmem>>, vector<8x32xf32>,
    } else {
    }
    return
  }
  func.func @transform_0(%arg0: i32, %arg1: i32, %arg2: memref<8xi32, #tpu.memory_space<smem>>, %arg3: memref<8xi32, #tpu.memory_space<smem>>) -> (i32, i32) {
    %c0_i32 = arith.constant 0 : i32
    %c0_i32_0 = arith.constant 0 : i32
    return %arg0, %c0_i32 : i32, i32
  }
  func.func @transform_1(%arg0: i32, %arg1: i32, %arg2: memref<8xi32, #tpu.memory_space<smem>>, %arg3: memref<8xi32, #tpu.memory_space<smem>>) -> (i32, i32, i32) {
    %0 = arith.index_cast %arg0 : i32 to index
    %1 = memref.load %arg2[%0] : memref<8xi32, #tpu.memory_space<smem>>
    %2 = arith.index_cast %arg0 : i32 to index
    %3 = memref.load %arg3[%2] : memref<8xi32, #tpu.memory_space<smem>>
    %4 = arith.muli %arg1, %3 : i32
    %c1_i32 = arith.constant 1 : i32
    %5 = arith.subi %c1_i32, %3 : i32
    %c1_i32_0 = arith.constant 1 : i32
    %6 = arith.muli %c1_i32_0, %5 : i32
    %7 = arith.addi %4, %6 : i32
    %c0_i32 = arith.constant 0 : i32
    %c0_i32_1 = arith.constant 0 : i32
    return %1, %c0_i32, %7 : i32, i32, i32
  }
  func.func @transform_2(%arg0: i32, %arg1: i32, %arg2: memref<8xi32, #tpu.memory_space<smem>>, %arg3: memref<8xi32, #tpu.memory_space<smem>>) -> (i32, i32, i32) {
    %0 = arith.index_cast %arg0 : i32 to index
    %1 = memref.load %arg2[%0] : memref<8xi32, #tpu.memory_space<smem>>
    %2 = arith.index_cast %arg0 : i32 to index
    %3 = memref.load %arg3[%2] : memref<8xi32, #tpu.memory_space<smem>>
    %4 = arith.muli %arg1, %3 : i32
    %c1_i32 = arith.constant 1 : i32
    %5 = arith.subi %c1_i32, %3 : i32
    %c1_i32_0 = arith.constant 1 : i32
    %6 = arith.muli %c1_i32_0, %5 : i32
    %7 = arith.addi %4, %6 : i32
    %c0_i32 = arith.constant 0 : i32
    %c0_i32_1 = arith.constant 0 : i32
    return %1, %c0_i32, %7 : i32, i32, i32
  }
  func.func @transform_3(%arg0: i32, %arg1: i32, %arg2: memref<8xi32, #tpu.memory_space<smem>>, %arg3: memref<8xi32, #tpu.memory_space<smem>>) -> (i32, i32, i32) {
    %0 = arith.index_cast %arg0 : i32 to index
    %1 = memref.load %arg2[%0] : memref<8xi32, #tpu.memory_space<smem>>
    %2 = arith.index_cast %arg0 : i32 to index
    %3 = memref.load %arg3[%2] : memref<8xi32, #tpu.memory_space<smem>>
    %4 = arith.muli %arg1, %3 : i32
    %c1_i32 = arith.constant 1 : i32
    %5 = arith.subi %c1_i32, %3 : i32
    %c1_i32_0 = arith.constant 1 : i32
    %6 = arith.muli %c1_i32_0, %5 : i32
    %7 = arith.addi %4, %6 : i32
    %c0_i32 = arith.constant 0 : i32
    %c0_i32_1 = arith.constant 0 : i32
    return %1, %7, %c0_i32 : i32, i32, i32
  }
  func.func @transform_4(%arg0: i32, %arg1: i32, %arg2: memref<8xi32, #tpu.memory_space<smem>>, %arg3: memref<8xi32, #tpu.memory_space<smem>>) -> (i32, i32) {
    %c0_i32 = arith.constant 0 : i32
    %c0_i32_0 = arith.constant 0 : i32
    return %arg0, %c0_i32 : i32, i32
  }
  func.func @transform_5(%arg0: i32, %arg1: i32, %arg2: memref<8xi32, #tpu.memory_space<smem>>, %arg3: memref<8xi32, #tpu.memory_space<smem>>) -> (i32, i32) {
    %c0_i32 = arith.constant 0 : i32
    %c0_i32_0 = arith.constant 0 : i32
    return %arg0, %c0_i32 : i32, i32
  }
}

</mosaic_0001>

<bundles_post_ra>
// kernel: custom-call.1
= control target key start
LH: loop header
LB: loop body
LE: loop exit
PB: predicated region body
PF: predicated region fallthrough
CT: control target
= control target key end

     0   :  { %s6_s0 = inlined_call_operand.vmem [shape: u32[8], index: 0, kind: output, shape index: {}]  }

// kernel: moe_forward.1
= control target key start
LH: loop header
LB: loop body
LE: loop exit
PB: predicated region body
PF: predicated region fallthrough
CT: control target
= control target key end

     0   :  { %s1480_s0 = inlined_call_operand.vmem [shape: s32[8], index: 0, kind: input, shape index: {}]   ;;  %s1481_s2 = inlined_call_operand.vmem [shape: f32[64,32], index: 2, kind: input, shape index: {}]   ;;  %s1482_s3 = inlined_call_operand.vmem [shape: f32[4,32,512], index: 3, kind: input, shape index: {}]   ;;  %s1483_s4 = inlined_call_operand.vmem [shape: f32[4,32,512], index: 4, kind: input, shape index: {}]   ;;  %s1484_s5 = inlined_call_operand.vmem [shape: f32[4,512,32], index: 5, kind: input, shape index: {}]   ;;  %s1485_s6 = inlined_call_operand.vmem [shape: f32[64,1], index: 6, kind: input, shape index: {}]   ;;  %s1486_s7 = inlined_call_operand.vmem [shape: f32[64,32], index: 7, kind: output, shape index: {}]   ;;  %s1487_s1 = inlined_call_operand.vmem [shape: s32[8], index: 1, kind: input, shape index: {}]  }
   0x1   :  { %1497 = sst [smem:[#allocation17_spill]] %s1481_s2  ;;  %s12_s26 = sshll.u32 %s1480_s0, 4  ;;  %s13_s26 = int_to_ptr.vmem [resolvable:$true] %s12_s26 }
   0x2   :  { %1498 = sst [smem:[#allocation18_spill]] %s1482_s3  ;;  %s16_s29 = sshll.u32 %s1487_s1, 4  ;;  %s17_s29 = int_to_ptr.vmem [resolvable:$true] %s16_s29 }
   0x3   :  { %1499 = sst [smem:[#allocation19_spill]] %s1483_s4  ;;  %s1096_s30 = scalar_lea.vmem %s13_s26, 16 }
   0x4   :  { %1500 = sst [smem:[#allocation20_spill]] %s1484_s5  ;;  %p1097_p0 = scmp.ne.s32.totalorder %s13_s26, %s1096_s30 }
   0x5   :  { %1501 = sst [smem:[#allocation21_spill]] %s1485_s6  ;;  %p1101_p1 = scmp.lt.s32.totalorder %s13_s26, %s13_s26 }
   0x6   :  { %1502 = sst [smem:[#allocation22_spill]] %s1486_s7  ;;  %p1102_p2 = scmp.lt.s32.totalorder %s1096_s30, %s1096_s30 }
   0x8   :  { %p1103_p3 = por %p1102_p2, %p1101_p1 }
   0xa   :  { %p1104_p4 = pnand %p1103_p3, %p1097_p0 }
   0xc   :  { %1107 = shalt.err (!%p1104_p4)  }
   0xd   :  { %s1194_s8 = smov [#allocation4]   ;;  %s1108_s9 = scalar_lea.vmem %s17_s29, 16 }
   0xe   :  { %15 = dma.vmem_to_smem %s13_s26, 16, %s1194_s8, [#allocation3] }
   0xf   :  { %p1109_p5 = scmp.ne.s32.totalorder %s17_s29, %s1108_s9  ;;  %p1113_p6 = scmp.lt.s32.totalorder %s17_s29, %s17_s29 }
  0x10   :  { %p1114_p7 = scmp.lt.s32.totalorder %s1108_s9, %s1108_s9 }
  0x12   :  { %p1115_p8 = por %p1114_p7, %p1113_p6 }
  0x14   :  { %p1116_p9 = pnand %p1115_p8, %p1109_p5 }
  0x16   :  { %1119 = shalt.err (!%p1116_p9)  }
  0x17   :  { %s1195_s0 = smov [#allocation5]  }
  0x18   :  { %19 = dma.vmem_to_smem %s17_s29, 16, %s1195_s0, [#allocation3] }
  0x19   :  { %1156 = dma.done.wait [#allocation3], 32 }
  0x1a   :  { %1157 = vsyncadd [#allocation3], 4294967264 }
  0x1b   :  { %21 = sfence }
  0x1c   :  { %s1246_s1 = smov 0   ;;  %s1248_s10 = smov 0  }
  0x1d   :  { %s1250_s11 = smov 0   ;;  %s1252_s12 = smov 0  }
  0x1e   :  { %s1254_s13 = smov 0   ;;  %s1256_s14 = smov 0  }
  0x1f   :  { %s1258_s15 = smov 0   ;;  %s1260_s16 = smov 0  }
  0x20   :  { %s1262_s17 = smov 0  }
  0x21 LB: > { %1503 = sst [smem:[#allocation9_spill]] %s1160_s1  ;;  %s36_s18 = sadd.s32 1, %s1184_s15  ;;  %s1192_s17 = sphi %s1262_s17, %s27_s17   ;;  %s1188_s16 = sphi %s1260_s16, %s1536_s16   ;;  %s1184_s15 = sphi %s1258_s15, %s1541_s15   ;;  %s1180_s14 = sphi %s1256_s14, %s1535_s14   ;;  %s1176_s13 = sphi %s1254_s13, %s1534_s13   ;;  %s1172_s12 = sphi %s1252_s12, %s1540_s12   ;;  %s1168_s11 = sphi %s1250_s11, %s1539_s11   ;;  %s1164_s10 = sphi %s1248_s10, %s1538_s10   ;;  %s1160_s1 = sphi %s1246_s1, %s1537_s1  }
  0x22   : > { %1504 = sst [smem:[#allocation10_spill]] %s1168_s11  ;;  %p37_p10 = scmp.ge.s32.totalorder %s36_s18, 2 }
  0x23   : > { %1505 = sst [smem:[#allocation11_spill]] %s1176_s13  ;;  %s39_s19 = sadd.s32 1, %s1188_s16 }
  0x24   : > { %1506 = sst [smem:[#allocation12_spill]] %s1180_s14  ;;  %s1543_s18 = smov (%p37_p10, %s36_s18), 0 }
  0x25   : > { %1507 = sst [smem:[#allocation13_spill]] %s1184_s15  ;;  %s1545_s19 = smov (!%p37_p10, %s39_s19), %s1188_s16 }
  0x26   : > { %1508 = sst [smem:[#allocation14_spill]] %s1188_s16  ;;  %p91_p11 = scmp.ne.s32.totalorder %s1172_s12, %s1168_s11 }
  0x27   : > { %s70_s20 = sld [smem:[#allocation5 + %s1188_s16]]  ;;  %p92_p12 = scmp.eq.s32.totalorder %s1192_s17, 0 }
  0x28   : > { %p41_p13 = scmp.ge.s32.totalorder %s1545_s19, 8  ;;  %s69_s21 = sld [smem:[#allocation4 + %s1188_s16]] }
  0x29   : > { %p1303_p0 = por %p92_p12, %p91_p11  ;;  %s108_s23 = sld [smem:[#allocation5 + %s1188_s16]] }
  0x2a   : > { %s1547_s19 = smov (%p41_p13, %s1545_s19), 0  ;;  %s107_s24 = sld [smem:[#allocation4 + %s1188_s16]] }
  0x2b   : > { %1510 = sst [smem:[#allocation15_spill]] %s1547_s19  ;;  %p129_p1 = scmp.ne.s32.totalorder %s1164_s10, %s1160_s1 }
  0x2c   : > { %s74_s25 = sld [smem:[#allocation4 + %s1547_s19]]  ;;  %s84_s7 = sadd.s32 1, %s1172_s12 }
  0x2d   : > { %s71_s26 = smul.u32 %s1184_s15, %s70_s20  ;;  %s75_s27 = sld [smem:[#allocation5 + %s1547_s19]] }
  0x2e   : > { %s112_s28 = sld [smem:[#allocation4 + %s1547_s19]]  ;;  %s72_s29 = ssub.s32 1, %s70_s20 }
  0x2f   : > { %s109_s30 = smul.u32 %s1184_s15, %s108_s23  ;;  %s113_s8 = sld [smem:[#allocation5 + %s1547_s19]] }
  0x30   : > { %p1321_p2 = por %p129_p1, %p92_p12  ;;  %s110_s0 = ssub.s32 1, %s108_s23 }
  0x31   : > { %s73_s5 = sadd.s32 %s72_s29, %s71_s26  ;;  %s111_s14 = sadd.s32 %s110_s0, %s109_s30 }
  0x32   : > { %s1511_s9 = scalar_select %p1321_p2, 1, 0 }
  0x33   : > { %s76_s6 = smul.u32 %s75_s27, %s1543_s18  ;;  %s77_s2 = ssub.s32 1, %s75_s27 }
  0x34   : > { %1512 = sst [smem:[#allocation16_spill]] %s1511_s9  ;;  %s79_s13 = ssub.s32 %s69_s21, %s74_s25 }
  0x35   : > { %s78_s11 = sadd.s32 %s77_s2, %s76_s6  ;;  %s117_s1 = ssub.s32 %s107_s24, %s112_s28 }
  0x36   : > { %s80_s20 = ssub.s32 %s73_s5, %s78_s11  ;;  %s114_s4 = smul.u32 %s113_s8, %s1543_s18 }
  0x37   : > { %s81_s19 = sor.u32 %s80_s20, %s79_s13  ;;  %s115_s3 = ssub.s32 1, %s113_s8 }
  0x38   : > { %p82_p3 = scmp.eq.s32.totalorder %s81_s19, 0  ;;  %s116_s15 = sadd.s32 %s115_s3, %s114_s4 }
  0x39   : > { %s118_s16 = ssub.s32 %s111_s14, %s116_s15  ;;  %s122_s26 = sadd.s32 1, %s1164_s10 }
  0x3a   : > { %s1329_s9 = scalar_select %p82_p3, %s1172_s12, %s84_s7  }
  0x3b   : > { %s119_s23 = sor.u32 %s118_s16, %s117_s1  ;;  %p947_p5 = scmp.ge.s32.totalorder %s1192_s17, 16 }
  0x3c   : > { %p120_p4 = scmp.eq.s32.totalorder %s119_s23, 0 }
  0x3d   : > { %245 = sbr.rel (%p947_p5) target bundleno = 116 (0x74), region = 16 }
  0x3e   : > { %s1333_s29 = scalar_select %p120_p4, %s1164_s10, %s122_s26  }
  0x42   : > { %255 = sbr.rel (!%p1303_p0) target bundleno = 91 (0x5b), region = 24  ;;  %s1513_s2 = sld [smem:[#allocation14_spill]] (%p1303_p0) }
  0x43   : > { %s1514_s5 = sld [smem:[#allocation13_spill]] (%p1303_p0)  ;;  %s257_s4 = sand.u32 (%p1303_p0), 1, %s1172_s12  }
  0x44   : > { %s948_s13 = sshll.u32 (%p1303_p0), %s257_s4, 6  ;;  %s1515_s25 = sld [smem:[#allocation18_spill]] (%p1303_p0) }
  0x45   : > { %s259_s27 = scalar_lea.vmem (%p1303_p0), [#allocation6], %s948_s13 }
  0x48   : > { %s260_s6 = sld [smem:[#allocation4 + %s1513_s2]] }
  0x49   : > { %s261_s3 = sld [smem:[#allocation5 + %s1513_s2]] }
  0x4e   : > { %s950_s1 = sshll.u32 %s260_s6, 4 }
  0x4f   : > { %s262_s7 = smul.u32 %s1514_s5, %s261_s3  ;;  %s263_s11 = ssub.s32 1, %s261_s3 }
  0x51   : > { %s264_s14 = sadd.s32 %s263_s11, %s262_s7 }
  0x52   : > { %s949_s15 = sshll.u32 %s264_s14, 1 }
  0x53   : > { %s267_s16 = sadd.s32 %s950_s1, %s949_s15 }
  0x54   : > { %s951_s19 = sshll.u32 %s267_s16, 3 }
  0x55   : > { %s269_s22 = scalar_lea.vmem %s1515_s25, %s951_s19 }
  0x56   : > { %v282_v0 = vld [vmem:[%s269_s22] sm:$0xff]  ;;  %v284_v1 = vld [vmem:[%s269_s22 + $0x8] sm:$0xff] }
  0x57   : > { %v286_v2 = vld [vmem:[%s269_s22 + $0x20] sm:$0xff]  ;;  %283 = vst [vmem:[%s259_s27] sm:$0xff] %v282_v0  ;;  %285 = vst [vmem:[%s259_s27 + $0x8] sm:$0xff] %v284_v1  ;;  %v288_v3 = vld [vmem:[%s269_s22 + $0x28] sm:$0xff] }
  0x58   : > { %287 = vst [vmem:[%s259_s27 + $0x10] sm:$0xff] %v286_v2  ;;  %v290_v4 = vld [vmem:[%s269_s22 + $0x40] sm:$0xff]  ;;  %v292_v5 = vld [vmem:[%s269_s22 + $0x48] sm:$0xff]  ;;  %289 = vst [vmem:[%s259_s27 + $0x18] sm:$0xff] %v288_v3 }
  0x59   : > { %291 = vst [vmem:[%s259_s27 + $0x20] sm:$0xff] %v290_v4  ;;  %293 = vst [vmem:[%s259_s27 + $0x28] sm:$0xff] %v292_v5  ;;  %v294_v6 = vld [vmem:[%s269_s22 + $0x60] sm:$0xff]  ;;  %v296_v7 = vld [vmem:[%s269_s22 + $0x68] sm:$0xff] }
  0x5a   : > { %295 = vst [vmem:[%s259_s27 + $0x30] sm:$0xff] %v294_v6  ;;  %297 = vst [vmem:[%s259_s27 + $0x38] sm:$0xff] %v296_v7 }
  0x5b PF: > { %303 = sbr.rel (!%p1321_p2) target bundleno = 116 (0x74), region = 47  ;;  %s1517_s30 = sld [smem:[#allocation14_spill]] (%p1321_p2) }
  0x5c   : > { %s1518_s8 = sld [smem:[#allocation13_spill]] (%p1321_p2)  ;;  %s305_s23 = sand.u32 (%p1321_p2), 1, %s1164_s10  }
  0x5d   : > { %s952_s6 = sshll.u32 (%p1321_p2), %s305_s23, 6  ;;  %s1519_s14 = sld [smem:[#allocation19_spill]] (%p1321_p2) }
  0x5e   : > { %s307_s16 = scalar_lea.vmem (%p1321_p2), [#allocation7], %s952_s6 }
  0x61   : > { %s308_s0 = sld [smem:[#allocation4 + %s1517_s30]] }
  0x62   : > { %s309_s20 = sld [smem:[#allocation5 + %s1517_s30]] }
  0x67   : > { %s954_s5 = sshll.u32 %s308_s0, 4 }
  0x68   : > { %s310_s26 = smul.u32 %s1518_s8, %s309_s20  ;;  %s311_s2 = ssub.s32 1, %s309_s20 }
  0x6a   : > { %s312_s3 = sadd.s32 %s311_s2, %s310_s26 }
  0x6b   : > { %s953_s4 = sshll.u32 %s312_s3, 1 }
  0x6c   : > { %s315_s7 = sadd.s32 %s954_s5, %s953_s4 }
  0x6d   : > { %s955_s11 = sshll.u32 %s315_s7, 3 }
  0x6e   : > { %s317_s15 = scalar_lea.vmem %s1519_s14, %s955_s11 }
  0x6f   : > { %v330_v8 = vld [vmem:[%s317_s15] sm:$0xff]  ;;  %v332_v9 = vld [vmem:[%s317_s15 + $0x8] sm:$0xff] }
  0x70   : > { %v334_v10 = vld [vmem:[%s317_s15 + $0x20] sm:$0xff]  ;;  %331 = vst [vmem:[%s307_s16] sm:$0xff] %v330_v8  ;;  %333 = vst [vmem:[%s307_s16 + $0x8] sm:$0xff] %v332_v9  ;;  %v336_v11 = vld [vmem:[%s317_s15 + $0x28] sm:$0xff] }
  0x71   : > { %335 = vst [vmem:[%s307_s16 + $0x10] sm:$0xff] %v334_v10  ;;  %v338_v12 = vld [vmem:[%s317_s15 + $0x40] sm:$0xff]  ;;  %v340_v13 = vld [vmem:[%s317_s15 + $0x48] sm:$0xff]  ;;  %337 = vst [vmem:[%s307_s16 + $0x18] sm:$0xff] %v336_v11 }
  0x72   : > { %339 = vst [vmem:[%s307_s16 + $0x20] sm:$0xff] %v338_v12  ;;  %341 = vst [vmem:[%s307_s16 + $0x28] sm:$0xff] %v340_v13  ;;  %v342_v14 = vld [vmem:[%s317_s15 + $0x60] sm:$0xff]  ;;  %v344_v15 = vld [vmem:[%s317_s15 + $0x68] sm:$0xff] }
  0x73   : > { %343 = vst [vmem:[%s307_s16 + $0x30] sm:$0xff] %v342_v14  ;;  %345 = vst [vmem:[%s307_s16 + $0x38] sm:$0xff] %v344_v15 }
  0x74 PF: > { %p956_p6 = scmp.ge.s32.totalorder %s1192_s17, 1  ;;  %p380_p7 = scmp.lt.s32.totalorder %s1192_s17, 17 }
  0x76   : > { %p381_p8 = pnand %p956_p6, %p380_p7 }
  0x77   : > { %s1520_s19 = sld [smem:[#allocation10_spill]] (!%p381_p8) }
  0x78   : > { %384 = sbr.rel (%p381_p8) target bundleno = 741 (0x2e5), region = 78  ;;  %s1521_s21 = sld [smem:[#allocation9_spill]] (!%p381_p8) }
  0x79   : > { %s1522_s24 = sld [smem:[#allocation12_spill]] (!%p381_p8) }
  0x7a   : > { %s1523_s25 = sld [smem:[#allocation11_spill]] (!%p381_p8) }
  0x7b   : > { %s1524_s6 = sld [smem:[#allocation17_spill]] (!%p381_p8) }
  0x7c   : > { %s1526_s15 = sld [smem:[#allocation22_spill]] (!%p381_p8) }
  0x7d   : > { %s387_s22 = sand.u32 1, %s1520_s19   ;;  %s1527_s4 = sld [smem:[#allocation20_spill]] }
  0x7e   : > { %s394_s27 = sand.u32 1, %s1521_s21   ;;  %s957_s28 = sshll.u32 %s387_s22, 6 }
  0x7f   : > { %s958_s30 = sshll.u32 %s394_s27, 6  ;;  %p446_p9 = scmp.lt.s32.totalorder %s1522_s24, 7 }
  0x80   : > { %s462_s8 = sld [smem:[#allocation4 + %s1522_s24]]  ;;  %s389_s11 = scalar_lea.vmem [#allocation6], %s957_s28 }
  0x81   : > { %s463_s0 = sld [smem:[#allocation5 + %s1522_s24]]  ;;  %s1387_s1 = scalar_lea.vmem [#allocation7], %s958_s30 }
  0x82   : > { %s447_s20 = scalar_select %p446_p9, %s1522_s24, 7 }
  0x83   : > { %s1363_s23 = sld [smem:[#allocation5 + %s1522_s24]] }
  0x84   : > { %s1365_s26 = sshll.u32 %s447_s20, 3 }
  0x85   : > { %s449_s3 = scalar_lea.vmem %s1524_s6, %s1365_s26  ;;  %s1379_s16 = scalar_lea.vmem %s1526_s15, %s1365_s26 }
  0x86   : > { %p468_p10 = scmp.lt.s32.totalorder %s462_s8, 3 }
  0x87   : > { %s464_s19 = smul.u32 %s1523_s25, %s463_s0  ;;  %s465_s21 = ssub.s32 1, %s463_s0 }
  0x88   : > { %s1549_s8 = smov (!%p468_p10, %s462_s8), 3 }
  0x89   : > { %s466_s24 = sadd.s32 %s465_s21, %s464_s19  ;;  %s961_s27 = sshll.u32 %s1549_s8, 6 }
  0x8a   : > { %s960_s22 = sshll.u32 %s466_s24, 5  ;;  %p965_p12 = scmp.eq.s32.totalorder %s1363_s23, 0 }
  0x8b   : > { %p470_p11 = scmp.lt.s32.totalorder %s960_s22, 63  ;;  %s1528_s25 = sld [smem:[#allocation11_spill]] (!%p965_p12) }
  0x8c   : > { %494 = sbr.rel (%p965_p12) target bundleno = 724 (0x2d4), region = 90 }
  0x8d   : > { %s1551_s22 = smov (!%p470_p11, %s960_s22), 63 }
  0x8e   : > { %s473_s20 = sadd.s32 %s961_s27, %s1551_s22 }
  0x8f   : > { %s962_s2 = sshll.u32 %s473_s20, 3 }
  0x90   : > { %s1385_s7 = scalar_lea.vmem %s1527_s4, %s962_s2 }
  0x91   : > { %p966_p13 = scmp.ne.s32.totalorder %s1528_s25, 0 }
  0x93   : > { %498 = sbr.rel (%p966_p13) target bundleno = 154 (0x9a), region = 94 }
  0x98   : > { %vm499_vm0 = vcmask 261120   ;;  %v1196_v16 = vmov 0.0  }
  0x99   : > { %500 = vst.msk [vmem:[#allocation2] sm:$0xff] %vm499_vm0, %v1196_v16 }
  0x9a PF: > { %v509_v17 = vld [vmem:[%s389_s11 + $0x38] sm:$0xff]  ;;  %v508_v18 = vld [vmem:[%s389_s11 + $0x30] sm:$0xff]  ;;  %v507_v19 = vld [vmem:[%s389_s11 + $0x28] sm:$0xff]  ;;  %v1197_v21 = vmov 0.0   ;;  %vm510_vm1 = vcmask 261120   ;;  %s1530_s0 = sld [smem:[#allocation11_spill]] }
  0x9b   : > { %538 = vmatprep.subr.mxu1 %v509_v17  ;;  %v506_v20 = vld [vmem:[%s389_s11 + $0x20] sm:$0xff]  ;;  %578 = vmatprep.mubr.f32.mxu1 %v1197_v21  ;;  %v505_v22 = vld [vmem:[%s389_s11 + $0x18] sm:$0xff]  ;;  %v504_v23 = vld [vmem:[%s389_s11 + $0x10] sm:$0xff] }
  0x9c   : > { %539 = vmatpush1.msra.mxu1 %v508_v18  ;;  %v503_v24 = vld [vmem:[%s389_s11 + $0x8] sm:$0xff]  ;;  %v502_v25 = vld [vmem:[%s389_s11] sm:$0xff]  ;;  %v501_v26 = vld [vmem:[%s449_s3] sm:$0xff] }
  0x9d   : > { %540 = vmatprep.subr.mxu1 %v507_v19  ;;  %v592_v27 = vld [vmem:[%s1387_s1 + $0x38] sm:$0xff]  ;;  %v591_v28 = vld [vmem:[%s1387_s1 + $0x30] sm:$0xff]  ;;  %v590_v29 = vld [vmem:[%s1387_s1 + $0x28] sm:$0xff] }
  0x9e   : > { %541 = vmatpush1.msra.mxu1 %v506_v20  ;;  %v589_v30 = vld [vmem:[%s1387_s1 + $0x20] sm:$0xff]  ;;  %v588_v31 = vld [vmem:[%s1387_s1 + $0x18] sm:$0xff]  ;;  %v587_v32 = vld [vmem:[%s1387_s1 + $0x10] sm:$0xff] }
  0x9f   : > { %542 = vmatprep.subr.mxu1 %v505_v22  ;;  %v586_v33 = vld [vmem:[%s1387_s1 + $0x8] sm:$0xff]  ;;  %v585_v34 = vld [vmem:[%s1387_s1] sm:$0xff]  ;;  %v712_v35 = vld [vmem:[%s1385_s7 + $0xf8] sm:$0xff] }
  0xa0   : > { %543 = vmatpush1.msra.mxu1 %v504_v23  ;;  %974 = vmatprep.subr.mxu0 %v712_v35  ;;  %v696_v36 = vld [vmem:[%s1385_s7 + $0x78] sm:$0xff]  ;;  %v711_v37 = vld [vmem:[%s1385_s7 + $0xf0] sm:$0xff]  ;;  %v710_v39 = vld [vmem:[%s1385_s7 + $0xe8] sm:$0xff]  ;;  %p971_p0 = scmp.ne.s32.totalorder %s1530_s0, 1 }
  0xa1   : > { %544 = vmatprep.subr.mxu1 %v503_v24  ;;  %975 = vmatpush3.msra.mxu0 %v696_v36  ;;  %v695_v38 = vld [vmem:[%s1385_s7 + $0x70] sm:$0xff]  ;;  %v694_v40 = vld [vmem:[%s1385_s7 + $0x68] sm:$0xff]  ;;  %v709_v41 = vld [vmem:[%s1385_s7 + $0xe0] sm:$0xff]  ;;  %s1531_s13 = sld [smem:[#allocation21_spill]] (!%p971_p0) }
  0xa2   : > { %545 = vmatpush1.msra.mxu1 %v502_v25  ;;  %976 = vmatprep.subr.mxu0 %v711_v37  ;;  %v693_v42 = vld [vmem:[%s1385_s7 + $0x60] sm:$0xff]  ;;  %v708_v43 = vld [vmem:[%s1385_s7 + $0xd8] sm:$0xff]  ;;  %v707_v45 = vld [vmem:[%s1385_s7 + $0xd0] sm:$0xff] }
  0xa3   : > { %967 = vmatmul.mubr.msk.f32.vlgmr.msra.gmra.mxu1 %vm510_vm1, %v501_v26  ;;  %617 = vmatprep.subr.mxu1 %v592_v27  ;;  %v692_v44 = vld [vmem:[%s1385_s7 + $0x58] sm:$0xff]  ;;  %v691_v46 = vld [vmem:[%s1385_s7 + $0x50] sm:$0xff]  ;;  %v706_v47 = vld [vmem:[%s1385_s7 + $0xc8] sm:$0xff] }
  0xa4   : > { %618 = vmatpush1.msra.mxu1 %v591_v28  ;;  %657 = vmatprep.mubr.f32.mxu1 %v1197_v21  ;;  %v690_v48 = vld [vmem:[%s1385_s7 + $0x48] sm:$0xff]  ;;  %v705_v49 = vld [vmem:[%s1385_s7 + $0xc0] sm:$0xff]  ;;  %v704_v51 = vld [vmem:[%s1385_s7 + $0xb8] sm:$0xff] }
  0xa5   : > { %619 = vmatprep.subr.mxu1 %v590_v29  ;;  %977 = vmatpush3.msra.mxu0 %v695_v38  ;;  %v689_v50 = vld [vmem:[%s1385_s7 + $0x40] sm:$0xff]  ;;  %v688_v52 = vld [vmem:[%s1385_s7 + $0x38] sm:$0xff]  ;;  %v703_v53 = vld [vmem:[%s1385_s7 + $0xb0] sm:$0xff] }
  0xa6   : > { %620 = vmatpush1.msra.mxu1 %v589_v30  ;;  %978 = vmatprep.subr.mxu0 %v710_v39  ;;  %v687_v54 = vld [vmem:[%s1385_s7 + $0x30] sm:$0xff]  ;;  %v702_v55 = vld [vmem:[%s1385_s7 + $0xa8] sm:$0xff]  ;;  %v701_v57 = vld [vmem:[%s1385_s7 + $0xa0] sm:$0xff] }
  0xa7   : > { %621 = vmatprep.subr.mxu1 %v588_v31  ;;  %979 = vmatpush3.msra.mxu0 %v694_v40  ;;  %v686_v56 = vld [vmem:[%s1385_s7 + $0x28] sm:$0xff]  ;;  %v685_v58 = vld [vmem:[%s1385_s7 + $0x20] sm:$0xff]  ;;  %v700_v59 = vld [vmem:[%s1385_s7 + $0x98] sm:$0xff]  ;;  %s1532_s14 = scalar_lea.vmem (!%p971_p0), %s1531_s13, %s1365_s26 }
  0xa8   : > { %622 = vmatpush1.msra.mxu1 %v587_v32  ;;  %980 = vmatprep.subr.mxu0 %v709_v41  ;;  %v684_v60 = vld [vmem:[%s1385_s7 + $0x18] sm:$0xff]  ;;  %v699_v61 = vld [vmem:[%s1385_s7 + $0x90] sm:$0xff]  ;;  %v698_v63 = vld [vmem:[%s1385_s7 + $0x88] sm:$0xff] }
  0xa9   : > { %623 = vmatprep.subr.mxu1 %v586_v33  ;;  %981 = vmatpush3.msra.mxu0 %v693_v42  ;;  %v683_v62 = vld [vmem:[%s1385_s7 + $0x10] sm:$0xff]  ;;  %v682_v0 = vld [vmem:[%s1385_s7 + $0x8] sm:$0xff]  ;;  %v697_v1 = vld [vmem:[%s1385_s7 + $0x80] sm:$0xff] }
  0xaa   : > { %624 = vmatpush1.msra.mxu1 %v585_v34  ;;  %982 = vmatprep.subr.mxu0 %v708_v43  ;;  %v681_v2 = vld [vmem:[%s1385_s7] sm:$0xff] }
  0xab   : > { %968 = vmatmul.mubr.msk.f32.vlgmr.msra.gmra.mxu1 %vm510_vm1, %v501_v26  ;;  %983 = vmatpush3.msra.mxu0 %v692_v44  ;;  %v680_v20 = vld [vmem:[#allocation2] sm:$0xff] }
  0xac   : > { %984 = vmatprep.subr.mxu0 %v707_v45 }
  0xad   : > { %985 = vmatpush3.msra.mxu0 %v691_v46 }
  0xae   : > { %986 = vmatprep.subr.mxu0 %v706_v47 }
  0xaf   : > { %987 = vmatpush3.msra.mxu0 %v690_v48 }
  0xb0   : > { %988 = vmatprep.subr.mxu0 %v705_v49 }
  0xb1   : > { %989 = vmatpush3.msra.mxu0 %v689_v50 }
  0xb2   : > { %990 = vmatprep.subr.mxu0 %v704_v51 }
  0xb3   : > { %991 = vmatpush3.msra.mxu0 %v688_v52 }
  0xb4   : > { %992 = vmatprep.subr.mxu0 %v703_v53 }
  0xb5   : > { %993 = vmatpush3.msra.mxu0 %v687_v54 }
  0xb6   : > { %994 = vmatprep.subr.mxu0 %v702_v55 }
  0xb7   : > { %995 = vmatpush3.msra.mxu0 %v686_v56 }
  0xb8   : > { %996 = vmatprep.subr.mxu0 %v701_v57 }
  0xb9   : > { %997 = vmatpush3.msra.mxu0 %v685_v58 }
  0xba   : > { %998 = vmatprep.subr.mxu0 %v700_v59 }
  0xbb   : > { %999 = vmatpush3.msra.mxu0 %v684_v60 }
  0xbc   : > { %1000 = vmatprep.subr.mxu0 %v699_v61 }
  0xbd   : > { %1001 = vmatpush3.msra.mxu0 %v683_v62 }
  0xbe   : > { %1002 = vmatprep.subr.mxu0 %v698_v63 }
  0xbf   : > { %1003 = vmatpush3.msra.mxu0 %v682_v0 }
  0xc0   : > { %1004 = vmatprep.subr.mxu0 %v697_v1 }
  0xc1   : > { %1005 = vmatpush3.msra.mxu0 %v681_v2 }
 0x163   : > { %v580_v3 = vpop.f32.mrf.mxu1 }
 0x164   : > { %v969_v4 = vmul.f32 -1.442695, %v580_v3 }
 0x165   : > { %v582_v5 = vpop.f32.mrf.mxu1 }
 0x166   : > { %1087 = vpow2.f32 %v969_v4  ;;  %v970_v6 = vmul.f32 -1.442695, %v582_v5 }
 0x168   : > { %1089 = vpow2.f32 %v970_v6 }
 0x16b   : > { %v659_v12 = vpop.f32.mrf.mxu1 }
 0x16d   : > { %v661_v16 = vpop.f32.mrf.mxu1 }
 0x173   : > { %v1088_v7 = vpop.eup %1087 }
 0x174   : > { %v670_v8 = vadd.f32 1.0, %v1088_v7 }
 0x175   : > { %v1090_v9 = vpop.eup %1089 }
 0x176   : > { %1091 = vrcp.f32 %v670_v8  ;;  %v671_v10 = vadd.f32 1.0, %v1090_v9 }
 0x178   : > { %1093 = vrcp.f32 %v671_v10 }
 0x183   : > { %v1092_v11 = vpop.eup %1091 }
 0x184   : > { %v676_v14 = vmul.f32 %v1092_v11, %v580_v3 }
 0x185   : > { %v1094_v13 = vpop.eup %1093 }
 0x186   : > { %v677_v15 = vmul.f32 %v1094_v13, %v582_v5  ;;  %v678_v18 = vmul.f32 %v676_v14, %v659_v12 }
 0x188   : > { %v679_v17 = vmul.f32 %v677_v15, %v661_v16 }
 0x18a   : > { %777 = vmatprep.mubr.f32.mxu0 %v679_v17 }
 0x18b   : > { %778 = vmatmul.mubr.f32.vlgmr.msra.gmra.mxu0 %v678_v18 }
 0x24b   : > { %v1006_v19 = vpop.f32.mrf.mxu0 }
 0x24d   : > { %v1007_v21 = vpop.f32.mrf.mxu0 }
 0x24e   : > { %v1008_v22 = vadd.f32 %v1007_v21, %v1006_v19  ;;  %788 = sbr.rel (%p971_p0) target bundleno = 724 (0x2d4), region = 98 }
 0x250   : > { %v783_v23 = vadd.f32 %v1008_v22, %v680_v20 }
 0x252   : > { %784 = vst.msk [vmem:[#allocation2] sm:$0xff] %vm510_vm1, %v783_v23 }
 0x253   : > { %v789_v24 = vld [vmem:[%s1532_s14] sm:$0xff]  ;;  %v1198_v25 = vmov 0  }
 0x254   : > { %1095 = vset.pattern.permute.xlu0 %v1198_v25 }
 0x255   : > { %793 = vperm.xlu0 %1095, %v789_v24  }
 0x259   : > { %v790_v26 = vld [vmem:[#allocation2] sm:$0xff] }
 0x2d0   : > { %v794_v27 = vpop.permute.xlu0 %793 }
 0x2d1   : > { %v796_v28 = vmul.f32 %v794_v27, %v790_v26 }
 0x2d3   : > { %797 = vst.msk [vmem:[%s1379_s16] sm:$0xff] %vm510_vm1, %v796_v28 }
 0x2d4 PF: > { %s1533_s15 = sld [smem:[#allocation11_spill]] }
 0x2da   : > { %p799_p1 = scmp.eq.s32.totalorder %s1533_s15, 1 }
 0x2dc   : > { %p800_p2 = pnand %p965_p12, %p799_p1 }
 0x2de   : > { %803 = sbr.rel (%p800_p2) target bundleno = 741 (0x2e5), region = 102 }
 0x2e3   : > { %vm804_vm2 = vcmask 261120   ;;  %v1199_v29 = vmov 0.0  }
 0x2e4   : > { %805 = vst.msk [vmem:[%s1379_s16] sm:$0xff] %vm804_vm2, %v1199_v29 }
 0x2e5 PF: > { %s27_s17 = sadd.s32 1, %s1192_s17   ;;  %s1534_s13 = sld [smem:[#allocation13_spill]] }
 0x2e6   : > { %p24_p3 = scmp.ge.s32.totalorder %s27_s17, 18   ;;  %s1535_s14 = sld [smem:[#allocation14_spill]] }
 0x2e7   : > { %s1536_s16 = sld [smem:[#allocation15_spill]]  ;;  %s1537_s1 = smov %s1164_s10 }
 0x2e8   : > { %s1538_s10 = smov %s1333_s29  ;;  %s1539_s11 = smov %s1172_s12 }
 0x2e9   : > { %s1540_s12 = smov %s1329_s9  ;;  %s1541_s15 = smov %s1543_s18 }
 0x2ea   :  { %26 = sbr.rel (!%p24_p3) target bundleno = 33 (0x21), region = 154 }

</bundles_post_ra>
